<compile_context>
chip_gen: v5e
topology: v5e:2x2
jax: 0.10.0
libtpu: 0.0.40
codegen_flags: <defaults>
</compile_context>

<pallas_src>
import math
import numpy as np
import jax
import jax.numpy as jnp
from jax.experimental import pallas as pl
from jax.experimental.pallas import tpu as pltpu

_MIB = 1024 * 1024


def _round_up(x, m):
    return (x + m - 1) // m * m


def _vmem_ceiling_bytes():
    """Usable scoped-VMEM budget per TensorCore, with headroom for compiler scratch.

    3/4 of physical: 48 MiB on v7x (64 MiB/TC), 96 MiB on v5e/v6e (128 MiB).
    Falls back to the v7x-safe 48 MiB if the hardware query is unavailable.
    """
    try:
        cap = int(pltpu.get_tpu_info().vmem_capacity_bytes)
    except Exception:
        cap = 64 * _MIB
    return (3 * cap) // 4


# --------------------------- Pallas kernel (hot path) ------------------------
# grid = (n_m // tm, n_k // tk)
#   axis 0: output row tiles              -> "parallel" (shards across v7x's 2 TCs)
#   axis 1: K reduction (A cols / HW rows) -> "arbitrary", innermost
def _make_ahw_kernel(resident_tk, precision):
    """out = A @ HW + bias, accumulated in-place in the resident f32 output block.

    resident_tk is None   -> HW is streamed per-k as a (tk, b_p) tile.
    resident_tk is an int -> HW is fully VMEM-resident as (n_k, b_p); a tk-row
                             slab is sliced out per reduction step.
    """
    def kernel(a_ref, hw_ref, bias_ref, out_ref):
        k = pl.program_id(1)

        @pl.when(k == 0)
        def _init():
            # Fold the bias in at init: no scratch accumulator, no epilogue pass.
            out_ref[...] = jnp.broadcast_to(bias_ref[...], out_ref.shape)

        if resident_tk is None:
            rhs = hw_ref[...]
        else:
            off = pl.multiple_of(k * resident_tk, 128)
            rhs = hw_ref[pl.ds(off, resident_tk), :]

        # MXU matmul, f32 accumulation directly into the resident output block
        # (out index_map is (i, 0) so it only writes back after the last k step).
        out_ref[...] += jnp.dot(a_ref[...], rhs,
                                preferred_element_type=jnp.float32,
                                precision=precision)

    return kernel


def hypergraph_matmul_bias_pallas(A, HW, bias, *, tm=512, tk=2048,
                                  mxu_dtype=jnp.bfloat16, hw_resident="auto"):
    """out = A @ HW + bias   (A: (n, n), HW: (n, b), bias: (b,)) -> (n, b) float32.

    A / HW feed the MXU in `mxu_dtype` (bf16 default halves HBM traffic on the
    dominant (n, n) A read; pass jnp.float32 for parity with the torch f32 layer,
    in which case the in-kernel dot runs at HIGHEST precision). Accumulation is
    always f32. If A is a numpy array it is cast + padded on the host, so there
    is no extra XLA cast/pad pass over ~6*n^2 bytes of HBM before the kernel.
    """
    n = int(A.shape[0])
    b = int(HW.shape[1])

    mxu_np_dtype = np.dtype(mxu_dtype)
    bpe = mxu_np_dtype.itemsize
    n128 = _round_up(n, 128)
    b_p = _round_up(b, 128)          # lane-dense output width (never widened past need)

    # ---------------- tile selection ----------------
    tm = min(_round_up(tm, 128), n128)
    tk = min(_round_up(tk, 128), n128)
    # Keep >= 2 row tiles when possible so the "parallel" row axis can be split
    # across v7x's two TensorCores.
    if tm == n128 and n128 >= 256:
        tm = _round_up(n128 // 2, 128)

    ceiling = _vmem_ceiling_bytes()

    def _streamed_need(tm_, tk_):
        return (2 * tm_ * tk_ * bpe        # A tile, double-buffered
                + 2 * tk_ * b_p * bpe      # HW tile, double-buffered
                + 2 * b_p * 4              # bias
                + 2 * tm_ * b_p * 4        # resident f32 output block
                + 2 * _MIB)                # headroom

    def _resident_need(tm_, tk_, n_k_):
        return (2 * tm_ * tk_ * bpe
                + 2 * n_k_ * b_p * bpe     # whole HW resident in VMEM
                + 2 * b_p * 4
                + 2 * tm_ * b_p * 4
                + 2 * _MIB)

    # Shrink tiles only if even the streamed layout would not fit (rare).
    while _streamed_need(tm, tk) > ceiling and tk > 128:
        tk = max(128, (tk // 256) * 128)
    while _streamed_need(tm, tk) > ceiling and tm > 128:
        tm = max(128, (tm // 256) * 128)

    n_m = _round_up(n, tm)
    n_k = _round_up(n, tk)
    grid = (n_m // tm, n_k // tk)

    if hw_resident == "auto":
        hw_resident = _resident_need(tm, tk, n_k) <= ceiling

    # ---------------- operand staging ----------------
    if isinstance(A, np.ndarray):
        # Cast + pad on the host: kills the device-side cast/pad pass over A and
        # halves the host->device transfer of the (n, n) matrix when bf16.
        A_host = np.zeros((n_m, n_k), dtype=mxu_np_dtype)
        A_host[:n, :n] = A.astype(mxu_np_dtype)
        A_p = jnp.asarray(A_host)
    else:
        A_p = jnp.pad(jnp.asarray(A).astype(mxu_dtype),
                      ((0, n_m - n), (0, n_k - n)))

    HW_p = jnp.pad(jnp.asarray(HW, jnp.float32).astype(mxu_dtype),
                   ((0, n_k - n), (0, b_p - b)))
    bias_p = jnp.pad(jnp.asarray(bias, jnp.float32).reshape(1, b),
                     ((0, 0), (0, b_p - b)))

    # ---------------- kernel configuration ----------------
    precision = (jax.lax.Precision.HIGHEST
                 if mxu_np_dtype == np.dtype(np.float32) else None)

    if hw_resident:
        kernel = _make_ahw_kernel(tk, precision)
        hw_spec = pl.BlockSpec((n_k, b_p), lambda i, k: (0, 0))   # fetched from HBM once
        vmem_need = _resident_need(tm, tk, n_k)
        hw_bytes = n_k * b_p * bpe
    else:
        kernel = _make_ahw_kernel(None, precision)
        hw_spec = pl.BlockSpec((tk, b_p), lambda i, k: (k, 0))    # re-streamed per row tile
        vmem_need = _streamed_need(tm, tk)
        hw_bytes = grid[0] * n_k * b_p * bpe

    cost = pl.CostEstimate(
        flops=2 * n_m * n_k * b_p,
        transcendentals=0,
        bytes_accessed=n_m * n_k * bpe + hw_bytes + n_m * b_p * 4 + b_p * 4,
    )

    compiler_params = pltpu.CompilerParams(
        dimension_semantics=("parallel", "arbitrary"),
        # Always set explicitly: v5e's scoped default is only 16 MiB; capped at
        # 3/4 of the physical VMEM of the current generation (48 MiB on v7x).
        vmem_limit_bytes=int(min(ceiling, max(vmem_need, 32 * _MIB))),
    )

    out_p = pl.pallas_call(
        kernel,
        out_shape=jax.ShapeDtypeStruct((n_m, b_p), jnp.float32),
        grid_spec=pltpu.PrefetchScalarGridSpec(
            num_scalar_prefetch=0,
            grid=grid,
            in_specs=[
                pl.BlockSpec((tm, tk), lambda i, k: (i, k)),   # A tile (streamed)
                hw_spec,                                       # HW (resident or streamed)
                pl.BlockSpec((1, b_p), lambda i, k: (0, 0)),   # bias (resident)
            ],
            out_specs=pl.BlockSpec((tm, b_p), lambda i, k: (i, 0)),
        ),
        compiler_params=compiler_params,
        cost_estimate=cost,
    )(A_p, HW_p, bias_p)

    return out_p[:n, :b]


# -------------- Host-side glue: hypergraph Laplacian approximation ----------
# Replicates Laplacian/adjacency/symnormalise from the reference (dense numpy,
# no scipy). Data-dependent dict/sparse graph construction; not kernel material.
def laplacian_dense(V, E, X, m=True, rng=None):
    rng = rng or np.random.RandomState(0)
    edges, weights = [], {}
    rv = rng.rand(X.shape[1])

    def bump(u, v, w):
        weights[(u, v)] = weights.get((u, v), 0.0) + float(w)

    for k in E.keys():
        hyperedge = list(E[k])
        p = np.dot(X[hyperedge], rv)
        s, i = np.argmax(p), np.argmin(p)
        Se, Ie = hyperedge[s], hyperedge[i]
        c = 2 * len(hyperedge) - 3
        if m:
            edges.extend([[Se, Ie], [Ie, Se]])
            bump(Se, Ie, 1.0 / c)
            bump(Ie, Se, 1.0 / c)
            for mediator in hyperedge:
                if mediator != Se and mediator != Ie:
                    edges.extend([[Se, mediator], [Ie, mediator],
                                  [mediator, Se], [mediator, Ie]])
                    bump(Se, mediator, 1.0 / c)
                    bump(Ie, mediator, 1.0 / c)
                    bump(mediator, Se, 1.0 / c)
                    bump(mediator, Ie, 1.0 / c)
        else:
            e = len(hyperedge)
            edges.extend([[Se, Ie], [Ie, Se]])
            bump(Se, Ie, 1.0 / e)
            bump(Ie, Se, 1.0 / e)

    # adjacency: dedup edges (weights already fully accumulated, matching the
    # coo/dict reference), unit-weight self loops, symmetric normalisation.
    adj = np.zeros((V, V), dtype=np.float64)
    seen = set()
    for e in edges:
        t = (int(e[0]), int(e[1]))
        if t in seen:
            continue
        seen.add(t)
        adj[t[0], t[1]] = weights[t]
    adj = adj + np.eye(V)
    d = adj.sum(1)
    with np.errstate(divide="ignore"):
        dhi = np.power(d, -0.5)
    dhi[np.isinf(dhi)] = 0.0
    A = (dhi[:, None] * adj) * dhi[None, :]
    return A.astype(np.float32)


# ----------------------------- Module wrapper --------------------------------
class HyperGraphConvolutionPallas:
    def __init__(self, a, b, reapproximate=True, key=None,
                 mxu_dtype=jnp.bfloat16, tm=512, tk=2048):
        self.a, self.b = a, b
        self.reapproximate = reapproximate
        self.mxu_dtype = mxu_dtype
        self.tm, self.tk = tm, tk
        key = key if key is not None else jax.random.PRNGKey(0)
        std = 1.0 / math.sqrt(b)
        k1, k2 = jax.random.split(key)
        self.W = jax.random.uniform(k1, (a, b), jnp.float32, -std, std)
        self.bias = jax.random.uniform(k2, (b,), jnp.float32, -std, std)

    def __call__(self, structure, H, m=True):
        H = jnp.asarray(H, jnp.float32)
        n = H.shape[0]
        # HW computed ONCE (device); reused for the Laplacian build and A @ HW.
        HW = jnp.dot(H, self.W, preferred_element_type=jnp.float32,
                     precision=jax.lax.Precision.HIGHEST)
        if self.reapproximate:
            # TODO(synk): the data-dependent graph-approximation build (argmax/argmin
            # per hyperedge, dict accumulation, dedup, symnorm) stays host-side numpy,
            # mirroring the original module's HW .cpu().numpy() round-trip.
            X = np.asarray(jax.device_get(HW), np.float32)
            A = laplacian_dense(n, structure, X, m, rng=np.random.RandomState(0))
        else:
            A = np.asarray(structure, np.float32)
        return hypergraph_matmul_bias_pallas(A, HW, self.bias,
                                             tm=self.tm, tk=self.tk,
                                             mxu_dtype=self.mxu_dtype)


if __name__ == "__main__":
    # small deterministic problem: n=256 nodes, a=64 in-features, b=32 out-features
    n, a, b = 256, 64, 32
    key = jax.random.PRNGKey(0)
    k_h, k_layer = jax.random.split(key)
    H = jax.random.normal(k_h, (n, a), jnp.float32)

    # deterministic hypergraph: 32 hyperedges with 4..8 nodes each
    structure = {e: [(8 * e + j) % n for j in range(4 + (e % 5))] for e in range(32)}

    # small tiles (tm=tk=128) give a 2x2 grid -> exercises init + K accumulation
    layer = HyperGraphConvolutionPallas(a, b, reapproximate=True, key=k_layer,
                                        mxu_dtype=jnp.bfloat16, tm=128, tk=128)
    out = jax.block_until_ready(layer(structure, H, m=True))
    assert out.shape == (n, b)

    # ---- references (host numpy; HW taken from device so only A@HW+b is compared)
    HW = jnp.dot(H, layer.W, preferred_element_type=jnp.float32,
                 precision=jax.lax.Precision.HIGHEST)
    HW_np = np.asarray(jax.device_get(HW), np.float32)
    A_np = laplacian_dense(n, structure, HW_np, True, rng=np.random.RandomState(0))
    bias_np = np.asarray(jax.device_get(layer.bias), np.float32)

    bf16 = np.dtype(jnp.bfloat16)
    ref_bf16 = (A_np.astype(bf16).astype(np.float32)
                @ HW_np.astype(bf16).astype(np.float32)) + bias_np
    np.testing.assert_allclose(np.asarray(out), ref_bf16, rtol=1e-3, atol=1e-3)

    # forced HW-streaming fallback path (same bf16 semantics)
    out_streamed = jax.block_until_ready(
        hypergraph_matmul_bias_pallas(A_np, HW, layer.bias, tm=128, tk=128,
                                      mxu_dtype=jnp.bfloat16, hw_resident=False))
    np.testing.assert_allclose(np.asarray(out_streamed), ref_bf16, rtol=1e-3, atol=1e-3)

    # f32 parity path (default big tiles, HW resident, HIGHEST-precision in-kernel dot)
    out_f32 = jax.block_until_ready(
        hypergraph_matmul_bias_pallas(A_np, HW, layer.bias, mxu_dtype=jnp.float32))
    ref_f32 = (A_np.astype(np.float64) @ HW_np.astype(np.float64)
               + bias_np).astype(np.float32)
    np.testing.assert_allclose(np.asarray(out_f32), ref_f32, rtol=1e-3, atol=1e-3)

    print("KERNEL_OK")
</pallas_src>

<mosaic_0001>
module attributes {stable_mosaic.version = 11 : i64} {
  func.func @kernel(%arg0: i32, %arg1: i32, %arg2: memref<128x128xbf16, #tpu.memory_space<vmem>>, %arg3: memref<256x128xbf16, #tpu.memory_space<vmem>>, %arg4: memref<1x128xf32, #tpu.memory_space<vmem>>, %arg5: memref<128x128xf32, #tpu.memory_space<vmem>>) attributes {dimension_semantics = [#tpu.dimension_semantics<parallel>, #tpu.dimension_semantics<arbitrary>], iteration_bounds = array<i64: 2, 2>, scalar_prefetch = 0 : i64, scratch_operands = 0 : i64, tpu.core_type = #tpu.core_type<tc>, window_params = [{transform_indices = @transform_0, window_bounds = array<i64: 128, 128>}, {pipeline_mode = #tpu.pipeline_mode<synchronous>, transform_indices = @transform_1, window_bounds = array<i64: 256, 128>}, {pipeline_mode = #tpu.pipeline_mode<synchronous>, transform_indices = @transform_2, window_bounds = array<i64: 1, 128>}, {transform_indices = @transform_3, window_bounds = array<i64: 128, 128>}]} {
    %c0_i32 = arith.constant 0 : i32
    %0 = arith.cmpi eq, %arg1, %c0_i32 : i32
    %1 = arith.extui %0 : i1 to i32
    %c0_i32_0 = arith.constant 0 : i32
    %2 = arith.cmpi ne, %1, %c0_i32_0 : i32
    scf.if %2 {
      %c0_7 = arith.constant 0 : index
      %c0_8 = arith.constant 0 : index
      %12 = vector.load %arg4[%c0_7, %c0_8] : memref<1x128xf32, #tpu.memory_space<vmem>>, vector<1x128xf32>
      %13 = vector.shape_cast %12 : vector<1x128xf32> to vector<1x128xf32>
      %14 = vector.broadcast %13 : vector<1x128xf32> to vector<128x128xf32>
      %c0_9 = arith.constant 0 : index
      %c0_10 = arith.constant 0 : index
      %15 = vector.load %arg5[%c0_9, %c0_10] : memref<128x128xf32, #tpu.memory_space<vmem>>, vector<128x128xf32>
      tpu.vector_store %arg5[%c0_9, %c0_10], %14 {strides = array<i32>} : memref<128x128xf32, #tpu.memory_space<vmem>>, vector<128x128xf32>,
    } else {
    }
    %c128_i32 = arith.constant 128 : i32
    %3 = arith.muli %arg1, %c128_i32 : i32
    %4 = tpu.assume_multiple %3, 128 : i32
    %5 = arith.index_cast %4 : i32 to index
    %c0 = arith.constant 0 : index
    %6 = vector.load %arg3[%5, %c0] : memref<256x128xbf16, #tpu.memory_space<vmem>>, vector<128x128xbf16>
    %c0_1 = arith.constant 0 : index
    %c0_2 = arith.constant 0 : index
    %7 = vector.load %arg5[%c0_1, %c0_2] : memref<128x128xf32, #tpu.memory_space<vmem>>, vector<128x128xf32>
    %c0_3 = arith.constant 0 : index
    %c0_4 = arith.constant 0 : index
    %8 = vector.load %arg2[%c0_3, %c0_4] : memref<128x128xbf16, #tpu.memory_space<vmem>>, vector<128x128xbf16>
    %cst = arith.constant dense<0.000000e+00> : vector<128x128xf32>
    %9 = tpu.matmul %8, %6, %cst {dimension_numbers = #tpu.dot_dimension_numbers<[1], [0], [0], [1], [0, 0, 1, 1], [], []>} : vector<128x128xbf16>, vector<128x128xbf16>, vector<128x128xf32> -> vector<128x128xf32>
    %10 = arith.addf %7, %9 : vector<128x128xf32>
    %c0_5 = arith.constant 0 : index
    %c0_6 = arith.constant 0 : index
    %11 = vector.load %arg5[%c0_5, %c0_6] : memref<128x128xf32, #tpu.memory_space<vmem>>, vector<128x128xf32>
    tpu.vector_store %arg5[%c0_5, %c0_6], %10 {strides = array<i32>} : memref<128x128xf32, #tpu.memory_space<vmem>>, vector<128x128xf32>,
    return
  }
  func.func @transform_0(%arg0: i32, %arg1: i32) -> (i32, i32) {
    %c0_i32 = arith.constant 0 : i32
    return %arg0, %arg1 : i32, i32
  }
  func.func @transform_1(%arg0: i32, %arg1: i32) -> (i32, i32) {
    %c0_i32 = arith.constant 0 : i32
    %c0_i32_0 = arith.constant 0 : i32
    %c0_i32_1 = arith.constant 0 : i32
    return %c0_i32, %c0_i32_0 : i32, i32
  }
  func.func @transform_2(%arg0: i32, %arg1: i32) -> (i32, i32) {
    %c0_i32 = arith.constant 0 : i32
    %c0_i32_0 = arith.constant 0 : i32
    %c0_i32_1 = arith.constant 0 : i32
    return %c0_i32, %c0_i32_0 : i32, i32
  }
  func.func @transform_3(%arg0: i32, %arg1: i32) -> (i32, i32) {
    %c0_i32 = arith.constant 0 : i32
    %c0_i32_0 = arith.constant 0 : i32
    return %arg0, %c0_i32 : i32, i32
  }
}

</mosaic_0001>

<bundles_post_ra>
// kernel: tpu_custom_call.1
= control target key start
LH: loop header
LB: loop body
LE: loop exit
PB: predicated region body
PF: predicated region fallthrough
CT: control target
= control target key end

     0   :  { %s1330_s0 = inlined_call_operand.hbm [shape: bf16[256,256], index: 0, kind: input, shape index: {}]   ;;  %s1331_s1 = inlined_call_operand.hbm [shape: bf16[256,128], index: 1, kind: input, shape index: {}]   ;;  %s1332_s2 = inlined_call_operand.vmem [shape: f32[1,128], index: 2, kind: input, shape index: {}]   ;;  %s1333_s3 = inlined_call_operand.hbm [shape: f32[256,128], index: 3, kind: output, shape index: {}]  }
   0x1   :  { %1343 = sst [smem:[#allocation17_spill]] %s1331_s1 }
   0x2   :  { %1344 = sst [smem:[#allocation18_spill]] %s1332_s2 }
   0x3   :  { %1345 = sst [smem:[#allocation19_spill]] %s1333_s3 }
   0x4   :  { %8 = vsyncpa [#allocation3], 0 }
   0x5   :  { %10 = vsyncpa [#allocation3 + $0x1], 0 }
   0x6   :  { %11 = vsyncpa [#allocation6], 0 }
   0x7   :  { %12 = vsyncpa [#allocation4], 0 }
   0x8   :  { %14 = vsyncpa [#allocation4 + $0x1], 0  ;;  %s1054_s12 = smov 0   ;;  %s1056_s13 = smov 0  }
   0x9   :  { %s1058_s14 = smov 0   ;;  %s1060_s15 = smov 0  }
   0xa   :  { %s1062_s16 = smov 0   ;;  %s1064_s17 = smov 0  }
   0xb   :  { %s1066_s18 = smov 0   ;;  %s1068_s19 = smov 0  }
   0xc   :  { %s1070_s20 = smov 0   ;;  %s1072_s21 = smov 0  }
   0xd   :  { %s1074_s22 = smov 0  }
   0xe LB: > { %1346 = sst [smem:[#allocation11_spill]] %s986_s12  ;;  %s594_s23 = sadd.s32 4294967295, %s1026_s22   ;;  %s1026_s22 = sphi %s1074_s22, %s20_s22   ;;  %s1022_s21 = sphi %s1072_s21, %s1378_s21   ;;  %s1018_s20 = sphi %s1070_s20, %s1377_s20   ;;  %s1014_s19 = sphi %s1068_s19, %s1376_s19   ;;  %s1010_s18 = sphi %s1066_s18, %s1375_s18   ;;  %s1006_s17 = sphi %s1064_s17, %s1374_s17   ;;  %s1002_s16 = sphi %s1062_s16, %s1373_s16   ;;  %s998_s15 = sphi %s1060_s15, %s1372_s15   ;;  %s994_s14 = sphi %s1058_s14, %s1371_s14   ;;  %s990_s13 = sphi %s1056_s13, %s1370_s13   ;;  %s986_s12 = sphi %s1054_s12, %s1369_s12  }
   0xf   : > { %1347 = sst [smem:[#allocation12_spill]] %s1014_s19  ;;  %s595_s24 = sadd.s32 4294967294, %s1026_s22  }
  0x10   : > { %p54_p0 = scmp.ne.s32.totalorder %s1002_s16, %s998_s15  ;;  %p1110_p1 = scmp.eq.s32.totalorder %s594_s23, 0 }
  0x11   : > { %p119_p2 = scmp.ne.s32.totalorder %s994_s14, %s990_s13  ;;  %p120_p3 = scmp.eq.s32.totalorder %s594_s23, 3 }
  0x12   : > { %p1118_p4 = por %p1110_p1, %p54_p0  ;;  %p125_p5 = scmp.ne.s32.totalorder %s990_s13, %s986_s12 }
  0x13   : > { %p1124_p6 = por %p120_p3, %p119_p2  ;;  %p126_p7 = scmp.eq.s32.totalorder %s595_s24, 3 }
  0x14   : > { %p596_p8 = scmp.ge.s32.totalorder %s1026_s22, 1  ;;  %p133_p9 = scmp.lt.s32.totalorder %s1026_s22, 5 }
  0x15   : > { %s1350_s27 = scalar_select %p1124_p6, 1, 0 }
  0x16   : > { %p1130_p10 = por %p126_p7, %p125_p5  ;;  %p1134_p11 = pnand %p596_p8, %p133_p9 }
  0x17   : > { %1351 = sst [smem:[#allocation13_spill]] %s1350_s27  ;;  %s1028_s6 = smov [#allocation5]  }
  0x18   : > { %s1352_s28 = scalar_select %p1130_p10, 1, 0 }
  0x19   : > { %s1355_s1 = sld [smem:[#allocation17_spill]]  ;;  %p729_p12 = pneg %p1134_p11 }
  0x1a   : > { %1353 = sst [smem:[#allocation14_spill]] %s1352_s28  ;;  %s146_s7 = sshll.u32 %s1028_s6, 4  ;;  %s147_s7 = int_to_ptr.vmem [resolvable:$true] %s146_s7 }
  0x1b   : > { %p730_p13 = pnand %p729_p12, %p1110_p1  ;;  %s1334_s8 = smov 64  }
  0x1c   : > { %s1335_s9 = smov 4   ;;  %s29_s10 = sadd.s32 1, %s1018_s20 }
  0x1d   : > { %s32_s11 = sadd.s32 1, %s1022_s21  ;;  %p30_p0 = scmp.ge.s32.totalorder %s29_s10, 2 }
  0x1e   : > { %s41_s15 = sadd.s32 1, %s1006_s17  ;;  %p48_p2 = scmp.ne.s32.totalorder %s1006_s17, %s1002_s16 }
  0x1f   : > { %s144_s5 = sshll.u32 %s1355_s1, 4  ;;  %p49_p3 = scmp.eq.s32.totalorder %s1026_s22, 0  ;;  %s145_s5 = int_to_ptr.hbm [resolvable:$true] %s144_s5 }
  0x20   : > { %732 = dma.hbm_to_vmem [thread:$0]  (!%p730_p13), %s145_s5, 2048, %s147_s7, [#allocation6], %s1334_s8, %s1334_s8, %s1335_s9  }
  0x21   : > { %s1380_s10 = smov (%p30_p0, %s29_s10), 0  ;;  %s1382_s11 = smov (!%p30_p0, %s32_s11), %s1022_s21 }
  0x22   : > { %1356 = sst [smem:[#allocation15_spill]] %s1380_s10  ;;  %s37_s23 = ssub.s32 %s1018_s20, %s1380_s10 }
  0x23   : > { %p1159_p5 = por %p49_p3, %p48_p2  ;;  %p34_p7 = scmp.ge.s32.totalorder %s1382_s11, 2 }
  0x24   : > { %s109_s30 = sadd.s32 1, %s994_s14  ;;  %p742_p8 = scmp.lt.s32.totalorder %s1026_s22, 4 }
  0x25   : > { %s163_s4 = sand.u32 1, %s1006_s17   ;;  %s1384_s11 = smov (%p34_p7, %s1382_s11), 0 }
  0x26   : > { %1358 = sst [smem:[#allocation16_spill]] %s1384_s11  ;;  %s599_s5 = sshll.u32 %s163_s4, 6 }
  0x27   : > { %s36_s6 = ssub.s32 %s1022_s21, %s1384_s11  ;;  %s679_s8 = sshll.u32 %s1022_s21, 5 }
  0x28   : > { %s38_s7 = sor.u32 %s37_s23, %s36_s6  ;;  %p107_p9 = scmp.eq.s32.totalorder %s36_s6, 0 }
  0x29   : > { %p39_p12 = scmp.eq.s32.totalorder %s38_s7, 0  ;;  %s172_s10 = sadd.s32 %s1018_s20, %s679_s8 }
  0x2a   : > { %s1172_s9 = scalar_select %p107_p9, %s994_s14, %s109_s30  }
  0x2b   : > { %s1175_s1 = scalar_select %p39_p12, %s1006_s17, %s41_s15  }
  0x2c   : > { %s167_s28 = scalar_lea.vmem [#allocation2], %s599_s5  ;;  %s602_s27 = sshll.u32 %s172_s10, 2 }
  0x2d   : > { %s177_s12 = sshll.u32 %s167_s28, 4  ;;  %s174_s2 = scalar_lea.hbm %s1330_s0, %s602_s27  ;;  %s178_s12 = int_to_ptr.vmem [resolvable:$true] %s177_s12 }
  0x2e   : > { %p734_p13 = pnand %p742_p8, %p1159_p5  ;;  %s175_s23 = sshll.u32 %s174_s2, 4  ;;  %s176_s23 = int_to_ptr.hbm [resolvable:$true] %s175_s23 }
  0x2f   : > { %s164_s6 = scalar_lea.sflag [#allocation3], %s163_s4  ;;  %s1031_s7 = smov 128  }
  0x30   : > { %s1359_s30 = smov 4   ;;  %s1360_s11 = smov 64  }
  0x31   : > { %736 = dma.hbm_to_vmem [thread:$0]  (!%p734_p13), %s176_s23, 1024, %s178_s12, %s164_s6, %s1031_s7, %s1360_s11, %s1359_s30  }
  0x32   : > { %189 = sbr.rel (%p1134_p11) target bundleno = 282 (0x11a), region = 32  ;;  %s191_s28 = sand.u32 (!%p1134_p11), 1, %s1002_s16  }
  0x33   : > { %s604_s8 = sshll.u32 (!%p1134_p11), %s191_s28, 6  ;;  %s192_s10 = scalar_lea.sflag (!%p1134_p11), [#allocation3], %s191_s28 }
  0x34   : > { %s1190_s3 = scalar_lea.vmem (!%p1134_p11), [#allocation2], %s604_s8 }
  0x37   : > { %973 = dma.done.wait (%p1118_p4), %s192_s10, 1024  }
  0x38   : > { %975 = vsyncadd (%p1118_p4), %s192_s10, 4294966272 }
  0x39   : > { %977 = dma.done.wait (%p1110_p1), [#allocation6], 2048  }
  0x3a   : > { %979 = vsyncadd (%p1110_p1), [#allocation6], 4294965248  ;;  %s221_s2 = sand.u32 1, %s990_s13   ;;  %p607_p11 = scmp.ne.s32.totalorder %s1010_s18, 0 }
  0x3b   : > { %s606_s12 = sshll.u32 %s221_s2, 7  ;;  %s1361_s26 = sld [smem:[#allocation18_spill]] (!%p607_p11) }
  0x3c   : > { %s1203_s19 = scalar_lea.vmem [#allocation7], %s606_s12  ;;  %229 = sbr.rel (%p607_p11) target bundleno = 82 (0x52), region = 44 }
  0x41   : > { %v839_v0 = vld [vmem:[%s1361_s26] ss:$0 sm:$0xff] }
  0x42   : > { %234 = vst [vmem:[%s1203_s19] sm:$0xff] %v839_v0 }
  0x43   : > { %235 = vst [vmem:[%s1203_s19 + $0x8] sm:$0xff] %v839_v0 }
  0x44   : > { %236 = vst [vmem:[%s1203_s19 + $0x10] sm:$0xff] %v839_v0 }
  0x45   : > { %237 = vst [vmem:[%s1203_s19 + $0x18] sm:$0xff] %v839_v0 }
  0x46   : > { %238 = vst [vmem:[%s1203_s19 + $0x20] sm:$0xff] %v839_v0 }
  0x47   : > { %239 = vst [vmem:[%s1203_s19 + $0x28] sm:$0xff] %v839_v0 }
  0x48   : > { %240 = vst [vmem:[%s1203_s19 + $0x30] sm:$0xff] %v839_v0 }
  0x49   : > { %241 = vst [vmem:[%s1203_s19 + $0x38] sm:$0xff] %v839_v0 }
  0x4a   : > { %242 = vst [vmem:[%s1203_s19 + $0x40] sm:$0xff] %v839_v0 }
  0x4b   : > { %243 = vst [vmem:[%s1203_s19 + $0x48] sm:$0xff] %v839_v0 }
  0x4c   : > { %244 = vst [vmem:[%s1203_s19 + $0x50] sm:$0xff] %v839_v0 }
  0x4d   : > { %245 = vst [vmem:[%s1203_s19 + $0x58] sm:$0xff] %v839_v0 }
  0x4e   : > { %246 = vst [vmem:[%s1203_s19 + $0x60] sm:$0xff] %v839_v0 }
  0x4f   : > { %247 = vst [vmem:[%s1203_s19 + $0x68] sm:$0xff] %v839_v0 }
  0x50   : > { %248 = vst [vmem:[%s1203_s19 + $0x70] sm:$0xff] %v839_v0 }
  0x51   : > { %249 = vst [vmem:[%s1203_s19 + $0x78] sm:$0xff] %v839_v0 }
  0x52 PF: > { %s608_s25 = sshll.u32 %s1010_s18, 7  ;;  %v688_v9 = vld [vmem:[%s1190_s3] sm:$0xff]  ;;  %v690_v10 = vld [vmem:[%s1190_s3 + $0x10] sm:$0xff]  ;;  %v689_v13 = vld [vmem:[%s1190_s3 + $0x8] sm:$0xff]  ;;  %s1362_s18 = sld [smem:[#allocation12_spill]] }
  0x53   : > { %s251_s11 = sshra.s32 %s608_s25, 3  ;;  %v692_v11 = vld [vmem:[%s1190_s3 + $0x20] sm:$0xff]  ;;  %v694_v12 = vld [vmem:[%s1190_s3 + $0x30] sm:$0xff]  ;;  %v691_v14 = vld [vmem:[%s1190_s3 + $0x18] sm:$0xff]  ;;  %s1363_s6 = sld [smem:[#allocation19_spill]] }
  0x54   : > { %s609_s15 = sshll.u32 %s251_s11, 2  ;;  %v693_v15 = vld [vmem:[%s1190_s3 + $0x28] sm:$0xff]  ;;  %v695_v16 = vld [vmem:[%s1190_s3 + $0x38] sm:$0xff]  ;;  %v271_v17 = vld [vmem:[%s1203_s19] sm:$0xff]  ;;  %s493_s28 = sshll.u32 %s1203_s19, 4  ;;  %s494_s28 = int_to_ptr.vmem [resolvable:$true] %s493_s28 }
  0x55   : > { %s1226_s24 = scalar_lea.vmem [#allocation5], %s609_s15  ;;  %v275_v18 = vld [vmem:[%s1203_s19 + $0x20] sm:$0xff]  ;;  %v272_v25 = vld [vmem:[%s1203_s19 + $0x8] sm:$0xff]  ;;  %v273_v37 = vld [vmem:[%s1203_s19 + $0x10] sm:$0xff]  ;;  %s481_s10 = scalar_lea.sflag [#allocation4], %s221_s2 }
  0x56   : > { %v687_v1 = vld [vmem:[%s1226_s24 + $0x38] sm:$0xff]  ;;  %v686_v2 = vld [vmem:[%s1226_s24 + $0x30] sm:$0xff]  ;;  %v685_v3 = vld [vmem:[%s1226_s24 + $0x28] sm:$0xff] }
  0x57   : > { %399 = vmatpush.bf16.msra.mxu0 %v687_v1  ;;  %697 = vmatpush.bf16.msra.mxu1 %v687_v1  ;;  %v684_v4 = vld [vmem:[%s1226_s24 + $0x20] sm:$0xff]  ;;  %v683_v5 = vld [vmem:[%s1226_s24 + $0x18] sm:$0xff]  ;;  %v682_v6 = vld [vmem:[%s1226_s24 + $0x10] sm:$0xff] }
  0x58   : > { %698 = vmatpush.bf16.msra.mxu2 %v687_v1  ;;  %699 = vmatpush.bf16.msra.mxu3 %v687_v1  ;;  %v681_v7 = vld [vmem:[%s1226_s24 + $0x8] sm:$0xff]  ;;  %v680_v8 = vld [vmem:[%s1226_s24] sm:$0xff]  ;;  %v277_v38 = vld [vmem:[%s1203_s19 + $0x30] sm:$0xff]  ;;  %s696_s4 = sshll.u32 %s1362_s18, 7 }
  0x59   : > { %v279_v23 = vld [vmem:[%s1203_s19 + $0x40] sm:$0xff]  ;;  %v276_v26 = vld [vmem:[%s1203_s19 + $0x28] sm:$0xff]  ;;  %v281_v47 = vld [vmem:[%s1203_s19 + $0x50] sm:$0xff]  ;;  %s492_s7 = scalar_lea.hbm %s1363_s6, %s696_s4  ;;  %s920_s26 = scalar_lea.hbm %s1363_s6, 256 }
  0x5a   : > { %v283_v24 = vld [vmem:[%s1203_s19 + $0x60] sm:$0xff]  ;;  %v280_v35 = vld [vmem:[%s1203_s19 + $0x48] sm:$0xff]  ;;  %v285_v48 = vld [vmem:[%s1203_s19 + $0x70] sm:$0xff]  ;;  %s495_s8 = sshll.u32 %s492_s7, 4  ;;  %s496_s8 = int_to_ptr.hbm [resolvable:$true] %s495_s8 }
  0x5b   : > { %400 = vmatpush.bf16.msra.mxu0 %v686_v2  ;;  %700 = vmatpush.bf16.msra.mxu1 %v686_v2  ;;  %v284_v36 = vld [vmem:[%s1203_s19 + $0x68] sm:$0xff]  ;;  %v274_v49 = vld [vmem:[%s1203_s19 + $0x18] sm:$0xff]  ;;  %s914_s3 = sshra.s32 %s496_s8, 4  ;;  %s915_s3 = int_to_ptr.hbm [resolvable:$true] %s914_s3 }
  0x5c   : > { %701 = vmatpush.bf16.msra.mxu2 %v686_v2  ;;  %702 = vmatpush.bf16.msra.mxu3 %v686_v2  ;;  %v278_v50 = vld [vmem:[%s1203_s19 + $0x38] sm:$0xff]  ;;  %s916_s12 = scalar_lea.hbm %s915_s3, 128  ;;  %p921_p2 = scmp.lt.s32.totalorder %s915_s3, %s1363_s6 }
  0x5d   : > { %v282_v59 = vld [vmem:[%s1203_s19 + $0x58] sm:$0xff]  ;;  %p917_p1 = scmp.ne.s32.totalorder %s915_s3, %s916_s12  ;;  %p922_p3 = scmp.lt.s32.totalorder %s920_s26, %s916_s12 }
  0x5e   : > { %v286_v60 = vld [vmem:[%s1203_s19 + $0x78] sm:$0xff] }
  0x5f   : > { %401 = vmatpush.bf16.msra.mxu0 %v685_v3  ;;  %703 = vmatpush.bf16.msra.mxu1 %v685_v3  ;;  %p918_p4 = pnand %p917_p1, %p1124_p6  ;;  %p923_p5 = por %p922_p3, %p921_p2 }
  0x60   : > { %704 = vmatpush.bf16.msra.mxu2 %v685_v3  ;;  %705 = vmatpush.bf16.msra.mxu3 %v685_v3 }
  0x61   : > { %p919_p0 = pneg %p918_p4 }
  0x63   : > { %402 = vmatpush.bf16.msra.mxu0 %v684_v4  ;;  %706 = vmatpush.bf16.msra.mxu1 %v684_v4  ;;  %p924_p7 = pnand %p923_p5, %p919_p0 }
  0x64   : > { %707 = vmatpush.bf16.msra.mxu2 %v684_v4  ;;  %708 = vmatpush.bf16.msra.mxu3 %v684_v4 }
  0x67   : > { %403 = vmatpush.bf16.msra.mxu0 %v683_v5  ;;  %709 = vmatpush.bf16.msra.mxu1 %v683_v5 }
  0x68   : > { %710 = vmatpush.bf16.msra.mxu2 %v683_v5  ;;  %711 = vmatpush.bf16.msra.mxu3 %v683_v5 }
  0x6b   : > { %404 = vmatpush.bf16.msra.mxu0 %v682_v6  ;;  %712 = vmatpush.bf16.msra.mxu1 %v682_v6 }
  0x6c   : > { %713 = vmatpush.bf16.msra.mxu2 %v682_v6  ;;  %714 = vmatpush.bf16.msra.mxu3 %v682_v6 }
  0x6f   : > { %405 = vmatpush.bf16.msra.mxu0 %v681_v7  ;;  %715 = vmatpush.bf16.msra.mxu1 %v681_v7 }
  0x70   : > { %716 = vmatpush.bf16.msra.mxu2 %v681_v7  ;;  %717 = vmatpush.bf16.msra.mxu3 %v681_v7 }
  0x73   : > { %406 = vmatpush.bf16.msra.mxu0 %v680_v8  ;;  %718 = vmatpush.bf16.msra.mxu1 %v680_v8 }
  0x74   : > { %719 = vmatpush.bf16.msra.mxu2 %v680_v8  ;;  %720 = vmatpush.bf16.msra.mxu3 %v680_v8 }
  0x76   : > { %407 = vmatmul.bf16.vlgmr.msra.gmra.mxu0 %v688_v9  ;;  %417 = vmatmul.bf16.vlgmr.msra.gmra.mxu1 %v690_v10 }
  0x77   : > { %427 = vmatmul.bf16.vlgmr.msra.gmra.mxu2 %v692_v11  ;;  %437 = vmatmul.bf16.vlgmr.msra.gmra.mxu3 %v694_v12 }
  0x86   : > { %412 = vmatmul.bf16.gmra.mxu0 %v689_v13  ;;  %422 = vmatmul.bf16.gmra.mxu1 %v691_v14 }
  0x87   : > { %432 = vmatmul.bf16.gmra.mxu2 %v693_v15  ;;  %442 = vmatmul.bf16.gmra.mxu3 %v695_v16 }
  0xf3   : > { %v408_v19 = vpop.f32.mrf.mxu0  ;;  %v418_v20 = vpop.f32.mrf.mxu1 }
  0xf4   : > { %v448_v21 = vadd.f32 %v408_v19, %v271_v17  ;;  %v452_v22 = vadd.f32 %v418_v20, %v275_v18 }
  0xf6   : > { %464 = vst [vmem:[%s1203_s19] sm:$0xff] %v448_v21 }
  0xf7   : > { %468 = vst [vmem:[%s1203_s19 + $0x20] sm:$0xff] %v452_v22 }
  0xfa   : > { %v428_v27 = vpop.f32.mrf.mxu2  ;;  %v438_v28 = vpop.f32.mrf.mxu3 }
  0xfb   : > { %v456_v29 = vadd.f32 %v428_v27, %v279_v23  ;;  %v460_v30 = vadd.f32 %v438_v28, %v283_v24  ;;  %v410_v31 = vpop.f32.mrf.mxu0  ;;  %v420_v32 = vpop.f32.mrf.mxu1 }
  0xfc   : > { %v449_v33 = vadd.f32 %v410_v31, %v272_v25  ;;  %v453_v34 = vadd.f32 %v420_v32, %v276_v26 }
  0xfd   : > { %472 = vst [vmem:[%s1203_s19 + $0x40] sm:$0xff] %v456_v29 }
  0xfe   : > { %476 = vst [vmem:[%s1203_s19 + $0x60] sm:$0xff] %v460_v30 }
  0xff   : > { %465 = vst [vmem:[%s1203_s19 + $0x8] sm:$0xff] %v449_v33 }
 0x100   : > { %469 = vst [vmem:[%s1203_s19 + $0x28] sm:$0xff] %v453_v34 }
 0x102   : > { %v430_v39 = vpop.f32.mrf.mxu2  ;;  %v440_v40 = vpop.f32.mrf.mxu3 }
 0x103   : > { %v457_v41 = vadd.f32 %v430_v39, %v280_v35  ;;  %v461_v42 = vadd.f32 %v440_v40, %v284_v36  ;;  %v413_v43 = vpop.f32.mrf.mxu0  ;;  %v423_v44 = vpop.f32.mrf.mxu1 }
 0x104   : > { %v450_v45 = vadd.f32 %v413_v43, %v273_v37  ;;  %v454_v46 = vadd.f32 %v423_v44, %v277_v38 }
 0x105   : > { %473 = vst [vmem:[%s1203_s19 + $0x48] sm:$0xff] %v457_v41 }
 0x106   : > { %477 = vst [vmem:[%s1203_s19 + $0x68] sm:$0xff] %v461_v42 }
 0x107   : > { %466 = vst [vmem:[%s1203_s19 + $0x10] sm:$0xff] %v450_v45 }
 0x108   : > { %470 = vst [vmem:[%s1203_s19 + $0x30] sm:$0xff] %v454_v46 }
 0x10a   : > { %v433_v51 = vpop.f32.mrf.mxu2  ;;  %v443_v52 = vpop.f32.mrf.mxu3 }
 0x10b   : > { %v458_v53 = vadd.f32 %v433_v51, %v281_v47  ;;  %v462_v54 = vadd.f32 %v443_v52, %v285_v48  ;;  %v415_v55 = vpop.f32.mrf.mxu0  ;;  %v425_v56 = vpop.f32.mrf.mxu1 }
 0x10c   : > { %v451_v57 = vadd.f32 %v415_v55, %v274_v49  ;;  %v455_v58 = vadd.f32 %v425_v56, %v278_v50 }
 0x10d   : > { %474 = vst [vmem:[%s1203_s19 + $0x50] sm:$0xff] %v458_v53 }
 0x10e   : > { %478 = vst [vmem:[%s1203_s19 + $0x70] sm:$0xff] %v462_v54 }
 0x10f   : > { %467 = vst [vmem:[%s1203_s19 + $0x18] sm:$0xff] %v451_v57 }
 0x110   : > { %471 = vst [vmem:[%s1203_s19 + $0x38] sm:$0xff] %v455_v58 }
 0x112   : > { %v435_v61 = vpop.f32.mrf.mxu2  ;;  %v445_v62 = vpop.f32.mrf.mxu3 }
 0x113   : > { %v459_v63 = vadd.f32 %v435_v61, %v282_v59  ;;  %v463_v0 = vadd.f32 %v445_v62, %v286_v60 }
 0x115   : > { %475 = vst [vmem:[%s1203_s19 + $0x58] sm:$0xff] %v459_v63 }
 0x116   : > { %479 = vst [vmem:[%s1203_s19 + $0x78] sm:$0xff] %v463_v0 }
 0x117   : > { %927 = shalt.err (!%p924_p7)
}
 0x118   : > { %s1032_s2 = smov 128   ;;  %s1033_s19 = smov 8  }
 0x119   : > { %727 = dma.vmem_to_hbm [thread:$0]  (%p1124_p6), %s494_s28, 2048, %s496_s8, %s481_s10, %s1032_s2, %s1032_s2, %s1033_s19  }
 0x11a PF: > { %s1365_s15 = sld [smem:[#allocation11_spill]]  ;;  %p744_p8 = scmp.ge.s32.totalorder %s1026_s22, 2 }
 0x11c   : > { %p738_p9 = pnand %p744_p8, %p1130_p10 }
 0x11e   : > { %p739_p12 = pneg %p738_p9 }
 0x120   : > { %s510_s18 = sand.u32 1, %s1365_s15  }
 0x121   : > { %s511_s4 = scalar_lea.sflag [#allocation4], %s510_s18 }
 0x122   : > { %981 = dma.done.wait (%p739_p12), %s511_s4, 2048  }
 0x123   : > { %983 = vsyncadd (%p739_p12), %s511_s4, 4294965248  ;;  %s20_s22 = sadd.s32 1, %s1026_s22   ;;  %s1367_s5 = sld [smem:[#allocation15_spill]] }
 0x124   : > { %p17_p13 = scmp.ge.s32.totalorder %s20_s22, 6   ;;  %s1368_s23 = sld [smem:[#allocation16_spill]] }
 0x125   : > { %s1369_s12 = smov %s990_s13  ;;  %s1370_s13 = smov %s994_s14 }
 0x126   : > { %s1371_s14 = smov %s1172_s9  ;;  %s1372_s15 = smov %s1002_s16 }
 0x127   : > { %s1373_s16 = smov %s1006_s17  ;;  %s1374_s17 = smov %s1175_s1 }
 0x128   : > { %s1375_s18 = smov %s1018_s20  ;;  %s1376_s19 = smov %s1022_s21 }
 0x129   : > { %s1377_s20 = smov %s1367_s5  ;;  %19 = sbr.rel (!%p17_p13) target bundleno = 14 (0xe), region = 86 }
 0x12a   : > { %s1378_s21 = smov %s1368_s23 }
 0x12e   :  { %517 = vsyncpa [#allocation3], 1 }
 0x12f   :  { %519 = vsyncpa [#allocation3 + $0x1], 1 }
 0x130   :  { %520 = vsyncpa [#allocation6], 1 }
 0x131   :  { %521 = vsyncpa [#allocation4], 1 }
 0x132   :  { %523 = vsyncpa [#allocation4 + $0x1], 1 }

</bundles_post_ra>
